<compile_context>
chip_gen: v7x
topology: tpu7x:2x2x1
jax: 0.10.0
libtpu: 0.0.40
codegen_flags: <defaults>
</compile_context>

<pallas_src>
import jax
import jax.numpy as jnp
import numpy as np
from jax.experimental import pallas as pl
from jax.experimental.pallas import tpu as pltpu


# ---------------------------------------------------------------------------
# Kernel.
#   out[..., 2i]   = x[..., 2i]   * cos[2i]   - x[..., 2i+1] * sin[2i]
#   out[..., 2i+1] = x[..., 2i+1] * cos[2i+1] + x[..., 2i]   * sin[2i+1]
# implemented as   out = x*cos + roll(x,+1)*sin_even + roll(x,-1)*sin_odd
# where sin_even (= -sin on even lanes, 0 on odd) and sin_odd (= +sin on odd
# lanes, 0 on even) are precomputed, so every wrapped / boundary-crossing roll
# contribution is multiplied by an exact zero.
# ---------------------------------------------------------------------------
def _retnet_pos_kernel(x_ref, trig_ref, o_ref):
    x = x_ref[...]                              # (tb, tr, L), native dtype
    lane_axis = x.ndim - 1                      # pltpu.roll needs non-negative axis
    L = x.shape[-1]
    x_next = pltpu.roll(x, shift=L - 1, axis=lane_axis)   # x_next[..., j] = x[..., (j+1) % L]
    x_prev = pltpu.roll(x, shift=1, axis=lane_axis)       # x_prev[..., j] = x[..., (j-1) % L]

    cos = trig_ref[0]                           # (tr, L) f32
    sin_even = trig_ref[1]
    sin_odd = trig_ref[2]

    # bf16 * f32 promotes to f32, so compute is f32 without materializing
    # full-tile f32 copies of x / x_next / x_prev first.
    out = x * cos[None] + x_next * sin_even[None] + x_prev * sin_odd[None]
    o_ref[...] = out.astype(o_ref.dtype)


# ---------------------------------------------------------------------------
# Layout / tiling helpers.
# ---------------------------------------------------------------------------
def _fold_layout(S, D):
    """Lane-dense layout (R, L) for the per-head (S, D) slab."""
    if D % 128 == 0:
        return S, D, False
    if D % 2 == 0 and (S * D) % 128 == 0:
        return (S * D) // 128, 128, True        # fold into full 128-lane rows
    return S, D, False                          # fallback (masked stores)


def _build_trig_table(sin, cos):
    """Stack [cos, -sin@even lanes, +sin@odd lanes] into one (3, R, L) f32 table."""
    S, D = sin.shape
    R, L, folded = _fold_layout(S, D)
    parity = jnp.arange(D, dtype=jnp.int32) % 2
    sin32 = sin.astype(jnp.float32)
    cos32 = cos.astype(jnp.float32)
    sin_even = jnp.where(parity == 0, -sin32, 0.0)   # multiplies x[..., d+1] at even d
    sin_odd = jnp.where(parity == 1, sin32, 0.0)     # multiplies x[..., d-1] at odd d
    trig = jnp.stack([cos32, sin_even, sin_odd], axis=0)          # (3, S, D)
    if folded:
        trig = trig.reshape(3, R, L)
    return trig, (R, L, folded)


def _vmem_budget():
    """Generation-aware VMEM budget: never request the full physical VMEM."""
    try:
        cap = int(pltpu.get_tpu_info().vmem_capacity_bytes)
    except Exception:
        cap = 64 << 20                 # conservative: v7x has 64 MiB per TensorCore
    return int(min(cap * 3 // 4, 112 << 20))


def _choose_tiles(BH, R, L, itemsize, vmem_budget, target_tile_bytes):
    """Pick (tb rows of B*H, tr rows of R, #trig buffers) for one grid step."""
    headroom = 4 << 20
    trig_row = 3 * L * 4                     # f32 bytes per r-row of the trig table
    per_elem = 4 * itemsize + 3 * 4          # 2 in + 2 out buffers + ~3x f32 lowering temps

    def cost(tb, tr, trig_bufs):
        return tb * tr * L * per_elem + trig_bufs * tr * trig_row + headroom

    # Sequence-row tiling: prefer the full per-head slab with a resident,
    # single-buffered trig table; tile R only when that does not fit.
    if cost(1, R, 1) <= vmem_budget:
        tr, trig_bufs = R, 1
    else:
        per_tr = L * per_elem + 2 * trig_row
        tr = int((vmem_budget - headroom) // per_tr)
        tr = max(16, (tr // 16) * 16)        # multiple of 16: valid for f32 and bf16 tiles
        tr = min(tr, R)
        trig_bufs = 2
        if tr >= R:
            tr, trig_bufs = R, 1

    # Fused batch*heads tiling: hit the I/O byte target, stay inside the budget.
    row_bytes = tr * L * itemsize
    tb_target = max(1, target_tile_bytes // max(1, row_bytes))
    avail = max(1, vmem_budget - headroom - trig_bufs * tr * trig_row)
    tb_cap = max(1, avail // (tr * L * per_elem))
    tb = int(max(1, min(BH, tb_target, tb_cap)))
    return tb, tr, trig_bufs


# ---------------------------------------------------------------------------
# pallas_call wrapper.
# ---------------------------------------------------------------------------
def retnet_pos_apply(X, trig, layout, *, target_tile_bytes=8 << 20):
    """Apply rotation. X: (B, H, S, D); trig: (3, R, L) from _build_trig_table."""
    B, H, S, D = X.shape
    R, L, _folded = layout
    assert trig.shape == (3, R, L)
    BH = B * H
    Xr = X.reshape(BH, R, L)                 # pure metadata reshape (contiguous)

    itemsize = jnp.dtype(X.dtype).itemsize
    budget = _vmem_budget()
    tb, tr, trig_bufs = _choose_tiles(BH, R, L, itemsize, budget, target_tile_bytes)

    # Row axis OUTER, batch*head axis INNER -> the trig block index only changes
    # between row-blocks, so it is re-DMA'd at most cdiv(R, tr) times.
    grid = (pl.cdiv(R, tr), pl.cdiv(BH, tb))

    x_spec = pl.BlockSpec((tb, tr, L), lambda j, i: (i, j, 0))
    out_spec = pl.BlockSpec((tb, tr, L), lambda j, i: (i, j, 0))
    if trig_bufs == 1:
        # Constant index map over the whole grid -> a second revolving buffer is
        # pure VMEM waste; request a single buffer.
        try:
            trig_spec = pl.BlockSpec((3, tr, L), lambda j, i: (0, j, 0),
                                     pipeline_mode=pl.Buffered(1))
        except TypeError:
            trig_spec = pl.BlockSpec((3, tr, L), lambda j, i: (0, j, 0))
    else:
        trig_spec = pl.BlockSpec((3, tr, L), lambda j, i: (0, j, 0))

    # VMEM estimate: double-buffered in/out tiles + f32 lowering temporaries +
    # trig buffers; clamp to the generation-aware budget (never the full VMEM).
    need = tb * tr * L * (4 * itemsize + 12) + trig_bufs * 3 * tr * L * 4 + (4 << 20)
    vmem_limit = int(min(max(need + (4 << 20), 32 << 20), budget))

    out = pl.pallas_call(
        _retnet_pos_kernel,
        out_shape=jax.ShapeDtypeStruct((BH, R, L), X.dtype),
        grid_spec=pltpu.PrefetchScalarGridSpec(
            num_scalar_prefetch=0,
            grid=grid,
            in_specs=[x_spec, trig_spec],
            out_specs=out_spec,
        ),
        compiler_params=pltpu.CompilerParams(
            dimension_semantics=("parallel", "parallel"),
            vmem_limit_bytes=vmem_limit,
        ),
    )(Xr, trig)
    return out.reshape(B, H, S, D)


# ---------------------------------------------------------------------------
# Module wrapper (angle buffer + cached sin/cos tables; same semantics as the
# PyTorch RetNet_Pos.forward).
# ---------------------------------------------------------------------------
class RetNetPos:
    def __init__(self, hidden_dim):
        assert hidden_dim % 2 == 0
        self.hidden_dim = hidden_dim
        base = 1.0 / (10000.0 ** jnp.linspace(0.0, 1.0, hidden_dim // 2,
                                              dtype=jnp.float32))
        self.angle = jnp.repeat(base, 2)                 # (hidden_dim,)
        self._trig_cache = {}

    def _trig(self, S, slen, recurrence, conjugate):
        key = (int(S), int(slen), bool(recurrence), bool(conjugate))
        hit = self._trig_cache.get(key)
        if hit is not None:
            return hit
        D = self.hidden_dim
        if not recurrence:
            index = jnp.arange(slen, dtype=jnp.float32)
            angles = index[:, None] * self.angle[None, :]          # (slen, D)
            if angles.shape[0] != S:                               # torch-style broadcast
                assert angles.shape[0] == 1, "slen must equal X.shape[2] (or 1)"
                angles = jnp.broadcast_to(angles, (S, D))
        else:
            angles = jnp.broadcast_to((self.angle * (slen - 1))[None, :], (S, D))
        sin = jnp.sin(angles)
        cos = jnp.cos(angles)
        if conjugate:
            sin = -sin
        entry = _build_trig_table(sin, cos)
        self._trig_cache[key] = entry
        return entry

    def __call__(self, X, slen=1, recurrence=False, conjugate=False,
                 *, target_tile_bytes=8 << 20):
        B, H, S, D = X.shape
        assert D == self.hidden_dim
        trig, layout = self._trig(S, slen, recurrence, conjugate)
        return retnet_pos_apply(X, trig, layout, target_tile_bytes=target_tile_bytes)


# ---------------------------------------------------------------------------
# Pure-JAX reference (mirrors the PyTorch forward) for correctness checking.
# ---------------------------------------------------------------------------
def _rotate_every_two_ref(x):
    x1 = x[..., ::2]
    x2 = x[..., 1::2]
    return jnp.stack((-x2, x1), axis=-1).reshape(x.shape)


def _reference(X, angle, slen, recurrence=False, conjugate=False):
    if not recurrence:
        index = jnp.arange(slen, dtype=angle.dtype)
        angles = index[:, None] * angle[None, :]
    else:
        angles = angle * (slen - 1)
    sin = jnp.sin(angles)
    cos = jnp.cos(angles)
    if conjugate:
        sin = -sin
    return X * cos + _rotate_every_two_ref(X) * sin


if __name__ == "__main__":
    key = jax.random.PRNGKey(0)
    k1, k2, k3, k4 = jax.random.split(key, 4)

    # Test 1: f32, D multiple of 128 (no fold), single-block grid.
    B, H, S, D = 2, 4, 8, 128
    X = jax.random.normal(k1, (B, H, S, D), dtype=jnp.float32)
    mod = RetNetPos(D)
    out = jax.block_until_ready(mod(X, slen=S))
    assert out.shape == X.shape and out.dtype == X.dtype
    ref = _reference(X, mod.angle, slen=S)
    np.testing.assert_allclose(np.asarray(out), np.asarray(ref), rtol=1e-5, atol=1e-5)

    # Test 2: D=64 -> lane-dense fold to (S*D//128, 128); conjugate; tiny tile
    # target forces tb=4 over BH=6 to exercise the ragged (cdiv) last block.
    B2, H2, S2, D2 = 2, 3, 16, 64
    X2 = jax.random.normal(k2, (B2, H2, S2, D2), dtype=jnp.float32)
    mod2 = RetNetPos(D2)
    out2 = jax.block_until_ready(mod2(X2, slen=S2, conjugate=True,
                                      target_tile_bytes=16384))
    ref2 = _reference(X2, mod2.angle, slen=S2, conjugate=True)
    np.testing.assert_allclose(np.asarray(out2), np.asarray(ref2), rtol=1e-5, atol=1e-5)

    # Test 3: bf16 I/O (rolls in bf16, f32 math against the trig table).
    B3, H3, S3, D3 = 2, 4, 16, 128
    X3 = jax.random.normal(k3, (B3, H3, S3, D3), dtype=jnp.float32).astype(jnp.bfloat16)
    mod3 = RetNetPos(D3)
    out3 = jax.block_until_ready(mod3(X3, slen=S3))
    assert out3.dtype == jnp.bfloat16
    ref3 = _reference(X3, mod3.angle, slen=S3)          # f32 reference from bf16 input
    np.testing.assert_allclose(np.asarray(out3, dtype=np.float32),
                               np.asarray(ref3, dtype=np.float32),
                               rtol=2e-2, atol=2e-2)

    # Test 4: recurrence path (single-position angles broadcast over S).
    B4, H4, S4, D4 = 1, 2, 4, 128
    X4 = jax.random.normal(k4, (B4, H4, S4, D4), dtype=jnp.float32)
    mod4 = RetNetPos(D4)
    out4 = jax.block_until_ready(mod4(X4, slen=5, recurrence=True))
    ref4 = _reference(X4, mod4.angle, slen=5, recurrence=True)
    np.testing.assert_allclose(np.asarray(out4), np.asarray(ref4), rtol=1e-5, atol=1e-5)

    print("KERNEL_OK")
</pallas_src>

<mosaic_0001>
module attributes {stable_mosaic.version = 11 : i64} {
  func.func @_retnet_pos_kernel(%arg0: i32, %arg1: i32, %arg2: memref<8x8x128xf32, #tpu.memory_space<vmem>>, %arg3: memref<3x8x128xf32, #tpu.memory_space<vmem>>, %arg4: memref<8x8x128xf32, #tpu.memory_space<vmem>>) attributes {dimension_semantics = [#tpu.dimension_semantics<parallel>, #tpu.dimension_semantics<parallel>], iteration_bounds = array<i64: 1, 1>, scalar_prefetch = 0 : i64, scratch_operands = 0 : i64, tpu.core_type = #tpu.core_type<tc>, window_params = [{transform_indices = @transform_0, window_bounds = array<i64: 8, 8, 128>}, {pipeline_mode = #tpu.pipeline_mode<synchronous>, transform_indices = @transform_1, window_bounds = array<i64: 3, 8, 128>}, {transform_indices = @transform_2, window_bounds = array<i64: 8, 8, 128>}]} {
    %c0 = arith.constant 0 : index
    %c0_0 = arith.constant 0 : index
    %c0_1 = arith.constant 0 : index
    %0 = vector.load %arg2[%c0, %c0_0, %c0_1] : memref<8x8x128xf32, #tpu.memory_space<vmem>>, vector<8x8x128xf32>
    %c127_i32 = arith.constant 127 : i32
    %1 = tpu.dynamic_rotate %0 by %c127_i32 dim 2 : vector<8x8x128xf32>, i32 -> vector<8x8x128xf32>
    %c1_i32 = arith.constant 1 : i32
    %2 = tpu.dynamic_rotate %0 by %c1_i32 dim 2 : vector<8x8x128xf32>, i32 -> vector<8x8x128xf32>
    %c0_2 = arith.constant 0 : index
    %c0_3 = arith.constant 0 : index
    %c0_4 = arith.constant 0 : index
    %3 = vector.load %arg3[%c0_2, %c0_3, %c0_4] : memref<3x8x128xf32, #tpu.memory_space<vmem>>, vector<1x8x128xf32>
    %4 = vector.shape_cast %3 : vector<1x8x128xf32> to vector<8x128xf32>
    %c1 = arith.constant 1 : index
    %c0_5 = arith.constant 0 : index
    %c0_6 = arith.constant 0 : index
    %5 = vector.load %arg3[%c1, %c0_5, %c0_6] : memref<3x8x128xf32, #tpu.memory_space<vmem>>, vector<1x8x128xf32>
    %6 = vector.shape_cast %5 : vector<1x8x128xf32> to vector<8x128xf32>
    %c2 = arith.constant 2 : index
    %c0_7 = arith.constant 0 : index
    %c0_8 = arith.constant 0 : index
    %7 = vector.load %arg3[%c2, %c0_7, %c0_8] : memref<3x8x128xf32, #tpu.memory_space<vmem>>, vector<1x8x128xf32>
    %8 = vector.shape_cast %7 : vector<1x8x128xf32> to vector<8x128xf32>
    %9 = vector.shape_cast %4 : vector<8x128xf32> to vector<1x8x128xf32>
    %10 = vector.broadcast %9 : vector<1x8x128xf32> to vector<8x8x128xf32>
    %11 = arith.mulf %0, %10 : vector<8x8x128xf32>
    %12 = vector.shape_cast %6 : vector<8x128xf32> to vector<1x8x128xf32>
    %13 = vector.broadcast %12 : vector<1x8x128xf32> to vector<8x8x128xf32>
    %14 = arith.mulf %1, %13 : vector<8x8x128xf32>
    %15 = arith.addf %11, %14 : vector<8x8x128xf32>
    %16 = vector.shape_cast %8 : vector<8x128xf32> to vector<1x8x128xf32>
    %17 = vector.broadcast %16 : vector<1x8x128xf32> to vector<8x8x128xf32>
    %18 = arith.mulf %2, %17 : vector<8x8x128xf32>
    %19 = arith.addf %15, %18 : vector<8x8x128xf32>
    %c0_9 = arith.constant 0 : index
    %c0_10 = arith.constant 0 : index
    %c0_11 = arith.constant 0 : index
    %20 = vector.load %arg4[%c0_9, %c0_10, %c0_11] : memref<8x8x128xf32, #tpu.memory_space<vmem>>, vector<8x8x128xf32>
    tpu.vector_store %arg4[%c0_9, %c0_10, %c0_11], %19 {strides = array<i32>} : memref<8x8x128xf32, #tpu.memory_space<vmem>>, vector<8x8x128xf32>,
    return
  }
  func.func @transform_0(%arg0: i32, %arg1: i32) -> (i32, i32, i32) {
    %c0_i32 = arith.constant 0 : i32
    %c0_i32_0 = arith.constant 0 : i32
    return %arg1, %arg0, %c0_i32 : i32, i32, i32
  }
  func.func @transform_1(%arg0: i32, %arg1: i32) -> (i32, i32, i32) {
    %c0_i32 = arith.constant 0 : i32
    %c0_i32_0 = arith.constant 0 : i32
    %c0_i32_1 = arith.constant 0 : i32
    return %c0_i32, %arg0, %c0_i32_0 : i32, i32, i32
  }
  func.func @transform_2(%arg0: i32, %arg1: i32) -> (i32, i32, i32) {
    %c0_i32 = arith.constant 0 : i32
    %c0_i32_0 = arith.constant 0 : i32
    return %arg1, %arg0, %c0_i32 : i32, i32, i32
  }
}

</mosaic_0001>

<bundles_post_ra>
// kernel: tpu_custom_call.1
= control target key start
LH: loop header
LB: loop body
LE: loop exit
PB: predicated region body
PF: predicated region fallthrough
CT: control target
= control target key end

     0   :  { %7 = vsyncpa [#allocation3], 0  ;;  %s297_s0 = inlined_call_operand.hbm [shape: f32[8,8,128], index: 0, kind: input, shape index: {}]   ;;  %s298_s1 = inlined_call_operand.hbm [shape: f32[3,8,128], index: 1, kind: input, shape index: {}]   ;;  %s299_s2 = inlined_call_operand.hbm [shape: f32[8,8,128], index: 2, kind: output, shape index: {}]  }
   0x1   :  { %8 = vsyncpa [#allocation6], 0 }
   0x2   :  { %9 = vsyncpa [#allocation4], 0  ;;  %s230_s9 = smov [#allocation2]   ;;  %s158_s13 = scalar_lea.hbm %s297_s0, 1024 }
   0x3   :  { %s15_s10 = sshll.u32 %s230_s9, 4  ;;  %p159_p0 = scmp.ne.s32.totalorder %s297_s0, %s158_s13  ;;  %s16_s10 = int_to_ptr.vmem [resolvable:$true] %s15_s10 }
   0x4   :  { %p162_p1 = scmp.lt.u32.totalorder %s158_s13, %s297_s0 }
   0x6   :  { %p164_p2 = pnand %p162_p1, %p159_p0 }
   0x8   :  { %167 = shalt.err (!%p164_p2)
}
   0x9   :  { %s168_s18 = scalar_lea.vmem %s16_s10, 1024  ;;  %p173_p4 = scmp.lt.s32.totalorder %s16_s10, %s16_s10 }
   0xa   :  { %p169_p3 = scmp.ne.s32.totalorder %s16_s10, %s168_s18  ;;  %p174_p5 = scmp.lt.s32.totalorder %s168_s18, %s168_s18 }
   0xc   :  { %p175_p6 = por %p174_p5, %p173_p4 }
   0xe   :  { %p176_p7 = pnand %p175_p6, %p169_p3 }
  0x10   :  { %179 = shalt.err (!%p176_p7)
}
  0x11   :  { %s231_s19 = smov 128   ;;  %s232_s20 = smov 8  }
  0x12   :  { %21 = dma.hbm_to_vmem [thread:$0]  %s297_s0, 1024, %s16_s10, [#allocation3], %s231_s19, %s231_s19, %s232_s20  }
  0x13   :  { %s233_s23 = smov [#allocation5]   ;;  %s180_s27 = scalar_lea.hbm %s298_s1, 384 }
  0x14   :  { %s27_s24 = sshll.u32 %s233_s23, 4  ;;  %p181_p8 = scmp.ne.s32.totalorder %s298_s1, %s180_s27  ;;  %s28_s24 = int_to_ptr.vmem [resolvable:$true] %s27_s24 }
  0x15   :  { %p184_p9 = scmp.lt.u32.totalorder %s180_s27, %s298_s1 }
  0x17   :  { %p186_p10 = pnand %p184_p9, %p181_p8 }
  0x19   :  { %189 = shalt.err (!%p186_p10)
}
  0x1a   :  { %s190_s4 = scalar_lea.vmem %s28_s24, 384  ;;  %p195_p12 = scmp.lt.s32.totalorder %s28_s24, %s28_s24 }
  0x1b   :  { %p191_p11 = scmp.ne.s32.totalorder %s28_s24, %s190_s4  ;;  %p196_p13 = scmp.lt.s32.totalorder %s190_s4, %s190_s4 }
  0x1d   :  { %p197_p0 = por %p196_p13, %p195_p12 }
  0x1f   :  { %p198_p1 = pnand %p197_p0, %p191_p11 }
  0x21   :  { %201 = shalt.err (!%p198_p1)
}
  0x22   :  { %33 = dma.hbm_to_vmem [thread:$0]  %s298_s1, 384, %s28_s24, [#allocation6], %s231_s19, %s231_s19, %s232_s20  }
  0x23   :  { %224 = dma.done.wait [#allocation3], 1024  }
  0x24   :  { %225 = vsyncadd [#allocation3], 4294966272 }
  0x25   :  { %226 = dma.done.wait [#allocation6], 384  }
  0x26   :  { %227 = vsyncadd [#allocation6], 4294966912  ;;  %v42_v0 = vld [vmem:[#allocation2 + $0x10] sm:$0xff]  ;;  %v40_v1 = vld [vmem:[#allocation2] sm:$0xff]  ;;  %s234_s6 = smov 127   ;;  %s235_s1 = smov 1  }
  0x27   :  { %52 = vrot.lane.b32.xlu1 %v42_v0, %s234_s6  ;;  %48 = vrot.lane.b32.xlu0 %v40_v1, %s234_s6  ;;  %v43_v2 = vld [vmem:[#allocation2 + $0x18] sm:$0xff]  ;;  %v41_v3 = vld [vmem:[#allocation2 + $0x8] sm:$0xff]  ;;  %v44_v5 = vld [vmem:[#allocation2 + $0x20] sm:$0xff]  ;;  %s236_s7 = smov [#allocation7]  }
  0x28   :  { %v45_v4 = vld [vmem:[#allocation2 + $0x28] sm:$0xff]  ;;  %v47_v6 = vld [vmem:[#allocation2 + $0x38] sm:$0xff]  ;;  %v46_v7 = vld [vmem:[#allocation2 + $0x30] sm:$0xff]  ;;  %s138_s8 = sshll.u32 %s236_s7, 4  ;;  %s139_s8 = int_to_ptr.vmem [resolvable:$true] %s138_s8 }
  0x29   :  { %v80_v14 = vld [vmem:[#allocation5] sm:$0xff]  ;;  %v82_v15 = vld [vmem:[#allocation5 + $0x8] sm:$0xff]  ;;  %v84_v22 = vld [vmem:[#allocation5 + $0x10] sm:$0xff]  ;;  %s202_s9 = scalar_lea.vmem %s139_s8, 1024  ;;  %p207_p3 = scmp.lt.s32.totalorder %s139_s8, %s139_s8 }
  0x2a   :  { %v85_v16 = vmul.f32 %v80_v14, %v40_v1  ;;  %v86_v20 = vmul.f32 %v80_v14, %v41_v3  ;;  %v87_v23 = vmul.f32 %v80_v14, %v42_v0  ;;  %v88_v24 = vmul.f32 %v80_v14, %v43_v2  ;;  %p203_p2 = scmp.ne.s32.totalorder %s139_s8, %s202_s9  ;;  %p208_p4 = scmp.lt.s32.totalorder %s202_s9, %s202_s9 }
  0x2b   :  { %54 = vrot.lane.b32.xlu1 %v43_v2, %s234_s6  ;;  %50 = vrot.lane.b32.xlu0 %v41_v3, %s234_s6  ;;  %v90_v35 = vmul.f32 %v80_v14, %v45_v4  ;;  %v89_v36 = vmul.f32 %v80_v14, %v44_v5  ;;  %v92_v47 = vmul.f32 %v80_v14, %v47_v6 }
  0x2c   :  { %v91_v48 = vmul.f32 %v80_v14, %v46_v7  ;;  %p209_p5 = por %p208_p4, %p207_p3 }
  0x2e   :  { %p210_p6 = pnand %p209_p5, %p203_p2 }
  0x2f   :  { %58 = vrot.lane.b32.xlu1 %v45_v4, %s234_s6  ;;  %56 = vrot.lane.b32.xlu0 %v44_v5, %s234_s6 }
  0x33   :  { %62 = vrot.lane.b32.xlu1 %v47_v6, %s234_s6  ;;  %60 = vrot.lane.b32.xlu0 %v46_v7, %s234_s6 }
  0x37   :  { %66 = vrot.lane.b32.xlu1 %v41_v3, %s235_s1  ;;  %64 = vrot.lane.b32.xlu0 %v40_v1, %s235_s1 }
  0x3b   :  { %70 = vrot.lane.b32.xlu1 %v43_v2, %s235_s1  ;;  %68 = vrot.lane.b32.xlu0 %v42_v0, %s235_s1 }
  0x3f   :  { %74 = vrot.lane.b32.xlu1 %v45_v4, %s235_s1  ;;  %72 = vrot.lane.b32.xlu0 %v44_v5, %s235_s1 }
  0x43   :  { %78 = vrot.lane.b32.xlu1 %v47_v6, %s235_s1  ;;  %76 = vrot.lane.b32.xlu0 %v46_v7, %s235_s1 }
  0x99   :  { %v53_v8 = vpop.permute.xlu1 %52  ;;  %v49_v9 = vpop.permute.xlu0 %48 }
  0x9a   :  { %v93_v17 = vmul.f32 %v82_v15, %v49_v9  ;;  %v95_v25 = vmul.f32 %v82_v15, %v53_v8 }
  0x9c   :  { %v101_v26 = vadd.f32 %v93_v17, %v85_v16  ;;  %v103_v41 = vadd.f32 %v95_v25, %v87_v23 }
  0x9d   :  { %v55_v10 = vpop.permute.xlu1 %54  ;;  %v51_v11 = vpop.permute.xlu0 %50 }
  0x9e   :  { %v94_v21 = vmul.f32 %v82_v15, %v51_v11  ;;  %v96_v29 = vmul.f32 %v82_v15, %v55_v10 }
  0xa0   :  { %v102_v30 = vadd.f32 %v94_v21, %v86_v20  ;;  %v104_v42 = vadd.f32 %v96_v29, %v88_v24 }
  0xa1   :  { %v59_v12 = vpop.permute.xlu1 %58  ;;  %v57_v13 = vpop.permute.xlu0 %56 }
  0xa2   :  { %v98_v37 = vmul.f32 %v82_v15, %v59_v12  ;;  %v97_v38 = vmul.f32 %v82_v15, %v57_v13 }
  0xa4   :  { %v106_v49 = vadd.f32 %v98_v37, %v90_v35  ;;  %v105_v50 = vadd.f32 %v97_v38, %v89_v36 }
  0xa5   :  { %v63_v18 = vpop.permute.xlu1 %62  ;;  %v61_v19 = vpop.permute.xlu0 %60 }
  0xa6   :  { %v100_v53 = vmul.f32 %v82_v15, %v63_v18  ;;  %v99_v54 = vmul.f32 %v82_v15, %v61_v19 }
  0xa8   :  { %v108_v61 = vadd.f32 %v100_v53, %v92_v47  ;;  %v107_v62 = vadd.f32 %v99_v54, %v91_v48 }
  0xa9   :  { %v67_v27 = vpop.permute.xlu1 %66  ;;  %v65_v28 = vpop.permute.xlu0 %64 }
  0xaa   :  { %v110_v31 = vmul.f32 %v84_v22, %v67_v27  ;;  %v109_v32 = vmul.f32 %v84_v22, %v65_v28 }
  0xac   :  { %v118_v33 = vadd.f32 %v110_v31, %v102_v30  ;;  %v117_v34 = vadd.f32 %v109_v32, %v101_v26 }
  0xad   :  { %v71_v39 = vpop.permute.xlu1 %70  ;;  %v69_v40 = vpop.permute.xlu0 %68 }
  0xae   :  { %126 = vst [vmem:[#allocation7 + $0x8] sm:$0xff] %v118_v33  ;;  %125 = vst [vmem:[#allocation7] sm:$0xff] %v117_v34  ;;  %v112_v43 = vmul.f32 %v84_v22, %v71_v39  ;;  %v111_v44 = vmul.f32 %v84_v22, %v69_v40 }
  0xb0   :  { %v120_v45 = vadd.f32 %v112_v43, %v104_v42  ;;  %v119_v46 = vadd.f32 %v111_v44, %v103_v41 }
  0xb1   :  { %v75_v51 = vpop.permute.xlu1 %74  ;;  %v73_v52 = vpop.permute.xlu0 %72 }
  0xb2   :  { %128 = vst [vmem:[#allocation7 + $0x18] sm:$0xff] %v120_v45  ;;  %127 = vst [vmem:[#allocation7 + $0x10] sm:$0xff] %v119_v46  ;;  %v114_v55 = vmul.f32 %v84_v22, %v75_v51  ;;  %v113_v56 = vmul.f32 %v84_v22, %v73_v52 }
  0xb4   :  { %v122_v57 = vadd.f32 %v114_v55, %v106_v49  ;;  %v121_v58 = vadd.f32 %v113_v56, %v105_v50 }
  0xb5   :  { %v79_v59 = vpop.permute.xlu1 %78  ;;  %v77_v60 = vpop.permute.xlu0 %76 }
  0xb6   :  { %130 = vst [vmem:[#allocation7 + $0x28] sm:$0xff] %v122_v57  ;;  %129 = vst [vmem:[#allocation7 + $0x20] sm:$0xff] %v121_v58  ;;  %v116_v63 = vmul.f32 %v84_v22, %v79_v59  ;;  %v115_v0 = vmul.f32 %v84_v22, %v77_v60 }
  0xb8   :  { %v124_v1 = vadd.f32 %v116_v63, %v108_v61  ;;  %v123_v2 = vadd.f32 %v115_v0, %v107_v62 }
  0xba   :  { %132 = vst [vmem:[#allocation7 + $0x38] sm:$0xff] %v124_v1  ;;  %131 = vst [vmem:[#allocation7 + $0x30] sm:$0xff] %v123_v2 }
  0xbb   :  { %213 = shalt.err (!%p210_p6)
}
  0xbc   :  { %s214_s12 = scalar_lea.hbm %s299_s2, 1024 }
  0xbd   :  { %p215_p7 = scmp.ne.s32.totalorder %s299_s2, %s214_s12  ;;  %p218_p8 = scmp.lt.u32.totalorder %s214_s12, %s299_s2 }
  0xbf   :  { %p220_p9 = pnand %p218_p8, %p215_p7 }
  0xc1   :  { %223 = shalt.err (!%p220_p9)
}
  0xc2   :  { %144 = dma.vmem_to_hbm [thread:$0]  %s139_s8, 1024, %s299_s2, [#allocation4], %s231_s19, %s231_s19, %s232_s20  }
  0xc3   :  { %228 = dma.done.wait [#allocation4], 1024  }
  0xc4   :  { %229 = vsyncadd [#allocation4], 4294966272 }
  0xc5   :  { %148 = vsyncpa [#allocation3], 1 }
  0xc6   :  { %149 = vsyncpa [#allocation6], 1 }
  0xc7   :  { %150 = vsyncpa [#allocation4], 1 }

</bundles_post_ra>
